<compile_context>
chip_gen: v6e
topology: v6e:2x2x1
jax: 0.10.0
libtpu: 0.0.40
codegen_flags: <defaults>
</compile_context>

<pallas_src>
import jax
import jax.numpy as jnp
from jax.experimental import pallas as pl
from jax.experimental.pallas import tpu as pltpu

MAX_CHANNELS = 100
LANE = 128


def _round_up(a, m):
    return ((a + m - 1) // m) * m


def _pad_lane(c):
    return max(LANE, _round_up(c, LANE))


def _vmem_capacity_bytes():
    try:
        cap = int(getattr(pltpu.get_tpu_info(), "vmem_capacity_bytes"))
        if cap > 0:
            return cap
    except Exception:
        pass
    return 128 << 20  # v5e/v6e default


def _tile_plan(n, vmem_cap):
    """Row-tile size + padded node count, sized per TPU generation."""
    target = 512 if vmem_cap >= (96 << 20) else 256   # 128-MiB parts vs v7x 64 MiB
    if n <= target:
        tile_m = _round_up(max(n, 16), 16)            # 16-sublane aligned for bf16
        return tile_m, tile_m
    return target, _round_up(n, target)


# ----------------------------------------------------------------------------
# Fused kernel: grid = (layer l in {0,1,2}, dst-row tile i).
#   l == 0: h0 = relu((adj_tile @ x)      @ W1 + b1)  -> scratch buf 0
#   l == 1: h1 = relu((adj_tile @ h0_all) @ W2 + b2)  -> scratch buf 1
#   l == 2: y  = relu((adj_tile @ h1_all) @ W3 + b3)  -> out tile
# ----------------------------------------------------------------------------
def _make_kernel(tile_m, cin_pad):
    def kernel(x_ref, adj_ref, w_ref, b_ref, out_ref, h_scr):
        l = pl.program_id(0)
        i = pl.program_id(1)
        row0 = pl.multiple_of(i * tile_m, tile_m)

        adj = adj_ref[...]          # (tile_m, n_pad) bf16, streamed per row tile
        w = w_ref[0]                # (cstack, cstack) bf16, current layer
        b = b_ref[0]                # (1, cstack) f32,  current layer

        def layer(feat_bf16, w_in):
            p = jnp.dot(adj, feat_bf16, preferred_element_type=jnp.float32)
            h = jnp.dot(p.astype(jnp.bfloat16), w_in,
                        preferred_element_type=jnp.float32) + b
            return jnp.maximum(h, 0.0)

        # TODO(synk): Dropout(p=0.1) is the eval-mode identity; the training
        # RNG mask is not implemented.

        @pl.when(l == 0)
        def _():
            h = layer(x_ref[...], w[:cin_pad, :])
            h_scr[0, pl.ds(row0, tile_m), :] = h.astype(jnp.bfloat16)
            out_ref[...] = h[:, :out_ref.shape[1]].astype(out_ref.dtype)

        @pl.when(l == 1)
        def _():
            h = layer(h_scr[0], w)
            h_scr[1, pl.ds(row0, tile_m), :] = h.astype(jnp.bfloat16)
            out_ref[...] = h[:, :out_ref.shape[1]].astype(out_ref.dtype)

        @pl.when(l == 2)
        def _():
            h = layer(h_scr[1], w)
            out_ref[...] = h[:, :out_ref.shape[1]].astype(out_ref.dtype)

    return kernel


# ----------------------------------------------------------------------------
# gcn_norm (dense):  D^{-1/2} (A + I) D^{-1/2},  adj[dst, src]
# ----------------------------------------------------------------------------
def build_norm_adj(edge_index, n):
    src, dst = edge_index[0], edge_index[1]
    a = jnp.zeros((n, n), jnp.float32).at[dst, src].add(1.0)
    a = a + jnp.eye(n, dtype=jnp.float32)                  # add_self_loops
    deg = jnp.sum(a, axis=1)                               # in-degree (dst rows)
    dinv = jnp.where(deg > 0.0, 1.0 / jnp.sqrt(deg), 0.0)
    return a * dinv[:, None] * dinv[None, :]


def precompute_norm_adj(edge_index, n):
    """Cacheable: build once per static graph, reuse across forward calls."""
    return build_norm_adj(edge_index, n).astype(jnp.bfloat16)


# ----------------------------------------------------------------------------
# Parameter init. Real f32 [in,out] weights kept for the reference; the kernel
# gets a stacked, lane-padded bf16 weight tensor (no per-call casts).
# ----------------------------------------------------------------------------
def init_l3sgconv(key, c_in, c_out):
    dims = [c_in, MAX_CHANNELS * c_out, (MAX_CHANNELS // 2) * c_out, c_out]
    cstack = max(_pad_lane(d) for d in dims)               # 256 for c_out=2
    ks = jax.random.split(key, 3)
    layers = []
    w_stack = jnp.zeros((3, cstack, cstack), jnp.float32)
    b_stack = jnp.zeros((3, 1, cstack), jnp.float32)
    for li in range(3):
        ci, co = dims[li], dims[li + 1]
        kw, kb = jax.random.split(ks[li])
        bound = 1.0 / float(ci) ** 0.5
        w = jax.random.uniform(kw, (ci, co), jnp.float32, -bound, bound)  # = W.T
        b = jax.random.uniform(kb, (1, co), jnp.float32, -bound, bound)
        layers.append(dict(w=w, b=b))
        w_stack = w_stack.at[li, :ci, :co].set(w)
        b_stack = b_stack.at[li, 0, :co].set(b[0])
    return dict(layers=layers,
                w_stack=w_stack.astype(jnp.bfloat16),       # bf16 at init
                b_stack=b_stack,                            # f32 bias
                c_in=c_in, c_out=c_out,
                cin_pad=_pad_lane(c_in), cstack=cstack)


# ----------------------------------------------------------------------------
# Forward pass: one fused pallas_call over a (3, row-tile) grid.
# ----------------------------------------------------------------------------
def l3sgconv_forward(params, x, edge_index=None, adj_norm=None):
    n, c_in = x.shape
    if adj_norm is None:
        adj_norm = precompute_norm_adj(edge_index, n)

    cin_pad = params["cin_pad"]
    cstack = params["cstack"]
    c_out = params["c_out"]
    out_pad = LANE                                          # lane-dense output slab

    vmem_cap = _vmem_capacity_bytes()
    tile_m, n_pad = _tile_plan(n, vmem_cap)
    # ~3/4 of physical VMEM: ~96 MiB on v5e/v6e, ~48 MiB on v7x, with headroom.
    vmem_limit = max(32 << 20, (vmem_cap * 3) // 4)

    # Host-side lane padding / bf16 pre-cast (padded rows/cols are exact zeros).
    x_pad = jnp.zeros((n_pad, cin_pad), jnp.bfloat16).at[:n, :c_in].set(
        x.astype(jnp.bfloat16))
    adj_pad = jnp.zeros((n_pad, n_pad), jnp.bfloat16).at[:n, :n].set(
        adj_norm.astype(jnp.bfloat16))

    grid = (3, n_pad // tile_m)

    y_pad = pl.pallas_call(
        _make_kernel(tile_m, cin_pad),
        out_shape=jax.ShapeDtypeStruct((n_pad, out_pad), jnp.bfloat16),
        grid_spec=pltpu.PrefetchScalarGridSpec(
            num_scalar_prefetch=0,
            grid=grid,
            in_specs=[
                # x: resident across the whole grid (DMA'd once)
                pl.BlockSpec((n_pad, cin_pad), lambda l, i: (0, 0)),
                # adjacency: streamed dst-row tiles, re-streamed per layer
                pl.BlockSpec((tile_m, n_pad), lambda l, i: (i, 0)),
                # per-layer stacked weight / bias (change only when l changes)
                pl.BlockSpec((1, cstack, cstack), lambda l, i: (l, 0, 0)),
                pl.BlockSpec((1, 1, cstack), lambda l, i: (l, 0, 0)),
            ],
            out_specs=pl.BlockSpec((tile_m, out_pad), lambda l, i: (i, 0)),
            scratch_shapes=[pltpu.VMEM((2, n_pad, cstack), jnp.bfloat16)],
        ),
        compiler_params=pltpu.CompilerParams(
            dimension_semantics=("arbitrary", "arbitrary"),
            vmem_limit_bytes=int(vmem_limit),
        ),
    )(x_pad, adj_pad, params["w_stack"], params["b_stack"])

    # TODO(synk): for graphs where the (2, N, 256) activation scratch no longer
    # fits VMEM, replace the dense N x N adjacency with a CSR/segment layout fed
    # via scalar prefetch and split the layers into separate pallas_calls.
    return y_pad[:n, :c_out].astype(jnp.float32)


# ----------------------------------------------------------------------------
# Pure-JAX f32 reference (correctness check)
# ----------------------------------------------------------------------------
def l3sgconv_ref(params, x, edge_index):
    adj = build_norm_adj(edge_index, x.shape[0])
    h = x
    for layer in params["layers"]:
        h = jnp.maximum((adj @ h) @ layer["w"] + layer["b"], 0.0)
    return h


if __name__ == "__main__":
    key = jax.random.PRNGKey(0)
    k_x, k_e1, k_e2, k_p = jax.random.split(key, 4)

    N, C_IN, C_OUT = 16, 8, 2
    x = jax.random.normal(k_x, (N, C_IN), jnp.float32)

    # Random edges plus a ring so every node has at least one incoming edge.
    n_rand = 48
    src_r = jax.random.randint(k_e1, (n_rand,), 0, N)
    dst_r = jax.random.randint(k_e2, (n_rand,), 0, N)
    ring = jnp.arange(N)
    edge_index = jnp.stack([
        jnp.concatenate([src_r, ring]),
        jnp.concatenate([dst_r, (ring + 1) % N]),
    ]).astype(jnp.int32)                                   # shape [2, 64]

    params = init_l3sgconv(k_p, C_IN, C_OUT)               # 8 -> 200 -> 100 -> 2

    # Lane-padding invariant: padded bias columns must be exactly zero so that
    # ReLU(0)=0 propagates zeros through the padded channels of every layer.
    assert float(jnp.sum(jnp.abs(params["b_stack"][0, 0, MAX_CHANNELS * C_OUT:]))) == 0.0
    assert float(jnp.sum(jnp.abs(params["b_stack"][2, 0, C_OUT:]))) == 0.0

    adj_norm = precompute_norm_adj(edge_index, N)          # built once, reusable
    out = jax.block_until_ready(l3sgconv_forward(params, x, adj_norm=adj_norm))

    ref = l3sgconv_ref(params, x, edge_index)
    scale = float(jnp.max(jnp.abs(ref))) + 1e-6
    rel_err = float(jnp.max(jnp.abs(out - ref)) / scale)

    assert out.shape == (N, C_OUT), out.shape
    assert bool(jnp.all(jnp.isfinite(out)))
    assert rel_err < 5e-2, f"kernel/reference mismatch: rel err {rel_err}"
    print("KERNEL_OK")
</pallas_src>

<mosaic_0001>
module attributes {stable_mosaic.version = 11 : i64} {
  func.func @kernel(%arg0: i32, %arg1: i32, %arg2: memref<16x128xbf16, #tpu.memory_space<vmem>>, %arg3: memref<16x16xbf16, #tpu.memory_space<vmem>>, %arg4: memref<1x256x256xbf16, #tpu.memory_space<vmem>>, %arg5: memref<1x1x256xf32, #tpu.memory_space<vmem>>, %arg6: memref<16x128xbf16, #tpu.memory_space<vmem>>, %arg7: memref<2x16x256xbf16, #tpu.memory_space<vmem>>) attributes {dimension_semantics = [#tpu.dimension_semantics<arbitrary>, #tpu.dimension_semantics<arbitrary>], iteration_bounds = array<i64: 3, 1>, scalar_prefetch = 0 : i64, scratch_operands = 1 : i64, tpu.core_type = #tpu.core_type<tc>, window_params = [{pipeline_mode = #tpu.pipeline_mode<synchronous>, transform_indices = @transform_0, window_bounds = array<i64: 16, 128>}, {transform_indices = @transform_1, window_bounds = array<i64: 16, 16>}, {transform_indices = @transform_2, window_bounds = array<i64: 1, 256, 256>}, {transform_indices = @transform_3, window_bounds = array<i64: 1, 1, 256>}, {transform_indices = @transform_4, window_bounds = array<i64: 16, 128>}]} {
    %c16_i32 = arith.constant 16 : i32
    %0 = arith.muli %arg1, %c16_i32 : i32
    %1 = tpu.assume_multiple %0, 16 : i32
    %c0 = arith.constant 0 : index
    %c0_0 = arith.constant 0 : index
    %2 = vector.load %arg3[%c0, %c0_0] : memref<16x16xbf16, #tpu.memory_space<vmem>>, vector<16x16xbf16>
    %c0_1 = arith.constant 0 : index
    %c0_2 = arith.constant 0 : index
    %c0_3 = arith.constant 0 : index
    %3 = vector.load %arg4[%c0_1, %c0_2, %c0_3] : memref<1x256x256xbf16, #tpu.memory_space<vmem>>, vector<1x256x256xbf16>
    %4 = vector.shape_cast %3 : vector<1x256x256xbf16> to vector<256x256xbf16>
    %c0_4 = arith.constant 0 : index
    %c0_5 = arith.constant 0 : index
    %c0_6 = arith.constant 0 : index
    %5 = vector.load %arg5[%c0_4, %c0_5, %c0_6] : memref<1x1x256xf32, #tpu.memory_space<vmem>>, vector<1x1x256xf32>
    %6 = vector.shape_cast %5 : vector<1x1x256xf32> to vector<1x256xf32>
    %c0_i32 = arith.constant 0 : i32
    %7 = arith.cmpi eq, %arg0, %c0_i32 : i32
    %8 = arith.extui %7 : i1 to i32
    %c0_i32_7 = arith.constant 0 : i32
    %9 = arith.cmpi ne, %8, %c0_i32_7 : i32
    scf.if %9 {
      %c0_10 = arith.constant 0 : index
      %c0_11 = arith.constant 0 : index
      %16 = vector.load %arg2[%c0_10, %c0_11] : memref<16x128xbf16, #tpu.memory_space<vmem>>, vector<16x128xbf16>
      %17 = vector.extract_strided_slice %4 {offsets = [0, 0], sizes = [128, 256], strides = [1, 1]} : vector<256x256xbf16> to vector<128x256xbf16>
      %cst = arith.constant dense<0.000000e+00> : vector<16x128xf32>
      %18 = tpu.matmul %2, %16, %cst {dimension_numbers = #tpu.dot_dimension_numbers<[1], [0], [0], [1], [0, 0, 1, 1], [], []>} : vector<16x16xbf16>, vector<16x128xbf16>, vector<16x128xf32> -> vector<16x128xf32>
      %19 = arith.truncf %18 : vector<16x128xf32> to vector<16x128xbf16>
      %cst_12 = arith.constant dense<0.000000e+00> : vector<16x256xf32>
      %20 = tpu.matmul %19, %17, %cst_12 {dimension_numbers = #tpu.dot_dimension_numbers<[1], [0], [0], [1], [0, 0, 1, 1], [], []>} : vector<16x128xbf16>, vector<128x256xbf16>, vector<16x256xf32> -> vector<16x256xf32>
      %21 = vector.broadcast %6 : vector<1x256xf32> to vector<16x256xf32>
      %22 = arith.addf %20, %21 : vector<16x256xf32>
      %cst_13 = arith.constant 0.000000e+00 : f32
      %23 = vector.broadcast %cst_13 : f32 to vector<16x256xf32>
      %24 = arith.maximumf %22, %23 : vector<16x256xf32>
      %25 = arith.truncf %24 : vector<16x256xf32> to vector<16x256xbf16>
      %c0_14 = arith.constant 0 : index
      %26 = arith.index_cast %1 : i32 to index
      %c0_15 = arith.constant 0 : index
      %27 = vector.load %arg7[%c0_14, %26, %c0_15] : memref<2x16x256xbf16, #tpu.memory_space<vmem>>, vector<1x16x256xbf16>
      %28 = vector.shape_cast %27 : vector<1x16x256xbf16> to vector<16x256xbf16>
      %29 = vector.shape_cast %25 : vector<16x256xbf16> to vector<1x16x256xbf16>
      tpu.vector_store %arg7[%c0_14, %26, %c0_15], %29 {strides = array<i32>} : memref<2x16x256xbf16, #tpu.memory_space<vmem>>, vector<1x16x256xbf16>,
      %30 = vector.extract_strided_slice %24 {offsets = [0, 0], sizes = [16, 128], strides = [1, 1]} : vector<16x256xf32> to vector<16x128xf32>
      %31 = arith.truncf %30 : vector<16x128xf32> to vector<16x128xbf16>
      %c0_16 = arith.constant 0 : index
      %c0_17 = arith.constant 0 : index
      %32 = vector.load %arg6[%c0_16, %c0_17] : memref<16x128xbf16, #tpu.memory_space<vmem>>, vector<16x128xbf16>
      tpu.vector_store %arg6[%c0_16, %c0_17], %31 {strides = array<i32>} : memref<16x128xbf16, #tpu.memory_space<vmem>>, vector<16x128xbf16>,
    } else {
    }
    %c1_i32 = arith.constant 1 : i32
    %10 = arith.cmpi eq, %arg0, %c1_i32 : i32
    %11 = arith.extui %10 : i1 to i32
    %c0_i32_8 = arith.constant 0 : i32
    %12 = arith.cmpi ne, %11, %c0_i32_8 : i32
    scf.if %12 {
      %c0_10 = arith.constant 0 : index
      %c0_11 = arith.constant 0 : index
      %c0_12 = arith.constant 0 : index
      %16 = vector.load %arg7[%c0_10, %c0_11, %c0_12] : memref<2x16x256xbf16, #tpu.memory_space<vmem>>, vector<1x16x256xbf16>
      %17 = vector.shape_cast %16 : vector<1x16x256xbf16> to vector<16x256xbf16>
      %cst = arith.constant dense<0.000000e+00> : vector<16x256xf32>
      %18 = tpu.matmul %2, %17, %cst {dimension_numbers = #tpu.dot_dimension_numbers<[1], [0], [0], [1], [0, 0, 1, 1], [], []>} : vector<16x16xbf16>, vector<16x256xbf16>, vector<16x256xf32> -> vector<16x256xf32>
      %19 = arith.truncf %18 : vector<16x256xf32> to vector<16x256xbf16>
      %cst_13 = arith.constant dense<0.000000e+00> : vector<16x256xf32>
      %20 = tpu.matmul %19, %4, %cst_13 {dimension_numbers = #tpu.dot_dimension_numbers<[1], [0], [0], [1], [0, 0, 1, 1], [], []>} : vector<16x256xbf16>, vector<256x256xbf16>, vector<16x256xf32> -> vector<16x256xf32>
      %21 = vector.broadcast %6 : vector<1x256xf32> to vector<16x256xf32>
      %22 = arith.addf %20, %21 : vector<16x256xf32>
      %cst_14 = arith.constant 0.000000e+00 : f32
      %23 = vector.broadcast %cst_14 : f32 to vector<16x256xf32>
      %24 = arith.maximumf %22, %23 : vector<16x256xf32>
      %25 = arith.truncf %24 : vector<16x256xf32> to vector<16x256xbf16>
      %c1 = arith.constant 1 : index
      %26 = arith.index_cast %1 : i32 to index
      %c0_15 = arith.constant 0 : index
      %27 = vector.load %arg7[%c1, %26, %c0_15] : memref<2x16x256xbf16, #tpu.memory_space<vmem>>, vector<1x16x256xbf16>
      %28 = vector.shape_cast %27 : vector<1x16x256xbf16> to vector<16x256xbf16>
      %29 = vector.shape_cast %25 : vector<16x256xbf16> to vector<1x16x256xbf16>
      tpu.vector_store %arg7[%c1, %26, %c0_15], %29 {strides = array<i32>} : memref<2x16x256xbf16, #tpu.memory_space<vmem>>, vector<1x16x256xbf16>,
      %30 = vector.extract_strided_slice %24 {offsets = [0, 0], sizes = [16, 128], strides = [1, 1]} : vector<16x256xf32> to vector<16x128xf32>
      %31 = arith.truncf %30 : vector<16x128xf32> to vector<16x128xbf16>
      %c0_16 = arith.constant 0 : index
      %c0_17 = arith.constant 0 : index
      %32 = vector.load %arg6[%c0_16, %c0_17] : memref<16x128xbf16, #tpu.memory_space<vmem>>, vector<16x128xbf16>
      tpu.vector_store %arg6[%c0_16, %c0_17], %31 {strides = array<i32>} : memref<16x128xbf16, #tpu.memory_space<vmem>>, vector<16x128xbf16>,
    } else {
    }
    %c2_i32 = arith.constant 2 : i32
    %13 = arith.cmpi eq, %arg0, %c2_i32 : i32
    %14 = arith.extui %13 : i1 to i32
    %c0_i32_9 = arith.constant 0 : i32
    %15 = arith.cmpi ne, %14, %c0_i32_9 : i32
    scf.if %15 {
      %c1 = arith.constant 1 : index
      %c0_10 = arith.constant 0 : index
      %c0_11 = arith.constant 0 : index
      %16 = vector.load %arg7[%c1, %c0_10, %c0_11] : memref<2x16x256xbf16, #tpu.memory_space<vmem>>, vector<1x16x256xbf16>
      %17 = vector.shape_cast %16 : vector<1x16x256xbf16> to vector<16x256xbf16>
      %cst = arith.constant dense<0.000000e+00> : vector<16x256xf32>
      %18 = tpu.matmul %2, %17, %cst {dimension_numbers = #tpu.dot_dimension_numbers<[1], [0], [0], [1], [0, 0, 1, 1], [], []>} : vector<16x16xbf16>, vector<16x256xbf16>, vector<16x256xf32> -> vector<16x256xf32>
      %19 = arith.truncf %18 : vector<16x256xf32> to vector<16x256xbf16>
      %cst_12 = arith.constant dense<0.000000e+00> : vector<16x256xf32>
      %20 = tpu.matmul %19, %4, %cst_12 {dimension_numbers = #tpu.dot_dimension_numbers<[1], [0], [0], [1], [0, 0, 1, 1], [], []>} : vector<16x256xbf16>, vector<256x256xbf16>, vector<16x256xf32> -> vector<16x256xf32>
      %21 = vector.broadcast %6 : vector<1x256xf32> to vector<16x256xf32>
      %22 = arith.addf %20, %21 : vector<16x256xf32>
      %cst_13 = arith.constant 0.000000e+00 : f32
      %23 = vector.broadcast %cst_13 : f32 to vector<16x256xf32>
      %24 = arith.maximumf %22, %23 : vector<16x256xf32>
      %25 = vector.extract_strided_slice %24 {offsets = [0, 0], sizes = [16, 128], strides = [1, 1]} : vector<16x256xf32> to vector<16x128xf32>
      %26 = arith.truncf %25 : vector<16x128xf32> to vector<16x128xbf16>
      %c0_14 = arith.constant 0 : index
      %c0_15 = arith.constant 0 : index
      %27 = vector.load %arg6[%c0_14, %c0_15] : memref<16x128xbf16, #tpu.memory_space<vmem>>, vector<16x128xbf16>
      tpu.vector_store %arg6[%c0_14, %c0_15], %26 {strides = array<i32>} : memref<16x128xbf16, #tpu.memory_space<vmem>>, vector<16x128xbf16>,
    } else {
    }
    return
  }
  func.func @transform_0(%arg0: i32, %arg1: i32) -> (i32, i32) {
    %c0_i32 = arith.constant 0 : i32
    %c0_i32_0 = arith.constant 0 : i32
    %c0_i32_1 = arith.constant 0 : i32
    return %c0_i32, %c0_i32_0 : i32, i32
  }
  func.func @transform_1(%arg0: i32, %arg1: i32) -> (i32, i32) {
    %c0_i32 = arith.constant 0 : i32
    %c0_i32_0 = arith.constant 0 : i32
    return %arg1, %c0_i32 : i32, i32
  }
  func.func @transform_2(%arg0: i32, %arg1: i32) -> (i32, i32, i32) {
    %c0_i32 = arith.constant 0 : i32
    %c0_i32_0 = arith.constant 0 : i32
    %c0_i32_1 = arith.constant 0 : i32
    return %arg0, %c0_i32, %c0_i32_0 : i32, i32, i32
  }
  func.func @transform_3(%arg0: i32, %arg1: i32) -> (i32, i32, i32) {
    %c0_i32 = arith.constant 0 : i32
    %c0_i32_0 = arith.constant 0 : i32
    %c0_i32_1 = arith.constant 0 : i32
    return %arg0, %c0_i32, %c0_i32_0 : i32, i32, i32
  }
  func.func @transform_4(%arg0: i32, %arg1: i32) -> (i32, i32) {
    %c0_i32 = arith.constant 0 : i32
    %c0_i32_0 = arith.constant 0 : i32
    return %arg1, %c0_i32 : i32, i32
  }
}

</mosaic_0001>

<bundles_post_ra>
// kernel: tpu_custom_call.1
= control target key start
LH: loop header
LB: loop body
LE: loop exit
PB: predicated region body
PF: predicated region fallthrough
CT: control target
= control target key end

     0   :  { %s2234_s0 = inlined_call_operand.hbm [shape: bf16[16,128], index: 0, kind: input, shape index: {}]   ;;  %s2235_s1 = inlined_call_operand.hbm [shape: bf16[16,16], index: 1, kind: input, shape index: {}]   ;;  %s2236_s2 = inlined_call_operand.hbm [shape: bf16[3,256,256], index: 2, kind: input, shape index: {}]   ;;  %s2237_s3 = inlined_call_operand.hbm [shape: f32[3,1,256], index: 3, kind: input, shape index: {}]   ;;  %s2238_s4 = inlined_call_operand.hbm [shape: bf16[16,128], index: 4, kind: output, shape index: {}]  }
   0x1   :  { %2242 = sst [smem:[#allocation15_spill]] %s2234_s0 }
   0x2   :  { %9 = vsyncpa [#allocation4], 0 }
   0x3   :  { %10 = vsyncpa [#allocation7], 0 }
   0x4   :  { %11 = vsyncpa [#allocation5], 0  ;;  %s1784_s15 = smov 0   ;;  %s1786_s16 = smov 0  }
   0x5   :  { %s1788_s17 = smov 0   ;;  %s1790_s18 = smov 0  }
   0x6   :  { %s1792_s19 = smov 0   ;;  %s1794_s20 = smov 0  }
   0x7 LB: > { %s1813_s21 = sadd.s32 4294967295, %s1741_s20   ;;  %s83_s22 = sadd.s32 1, %s1729_s17  ;;  %s1741_s20 = sphi %s1794_s20, %s17_s20   ;;  %s1737_s19 = sphi %s1792_s19, %s2258_s19   ;;  %s1733_s18 = sphi %s1790_s18, %s2257_s18   ;;  %s1729_s17 = sphi %s1788_s17, %s2256_s17   ;;  %s1725_s16 = sphi %s1786_s16, %s2255_s16   ;;  %s1721_s15 = sphi %s1784_s15, %s2254_s15  }
   0x8   : > { %p90_p0 = scmp.ne.s32.totalorder %s1729_s17, %s1725_s16  ;;  %p91_p1 = scmp.eq.s32.totalorder %s1741_s20, 0 }
   0x9   : > { %p96_p2 = scmp.ne.s32.totalorder %s1725_s16, %s1721_s15  ;;  %p2239_p3 = scmp.eq.s32.totalorder %s1813_s21, 0 }
   0xa   : > { %p92_p4 = por %p91_p1, %p90_p0  ;;  %p1281_p5 = scmp.ge.s32.totalorder %s1741_s20, 1 }
   0xb   : > { %p1824_p6 = por %p2239_p3, %p96_p2  ;;  %p159_p7 = scmp.lt.s32.totalorder %s1741_s20, 4 }
   0xc   : > { %s1743_s25 = smov [#allocation3]   ;;  %p1473_p10 = scmp.lt.s32.totalorder %s1741_s20, 3 }
   0xd   : > { %p1829_p8 = pnand %p1281_p5, %p159_p7  ;;  %s171_s26 = sshll.u32 %s1743_s25, 4  ;;  %s172_s26 = int_to_ptr.vmem [resolvable:$true] %s171_s26 }
   0xe   : > { %p1842_p12 = pnand %p1473_p10, %p92_p4  ;;  %s29_s29 = sadd.s32 1, %s1737_s19 }
   0xf   : > { %p1457_p9 = pneg %p1829_p8  ;;  %s1558_s30 = scalar_lea.vmem %s172_s26, 128 }
  0x10   : > { %p1559_p0 = scmp.ne.s32.totalorder %s172_s26, %s1558_s30  ;;  %p1566_p5 = scmp.lt.s32.totalorder %s172_s26, %s172_s26 }
  0x11   : > { %p1838_p11 = pnand %p1457_p9, %p2239_p3  ;;  %p1567_p7 = scmp.lt.s32.totalorder %s1558_s30, %s1558_s30 }
  0x13   : > { %p1549_p13 = pneg %p1838_p11  ;;  %p1568_p9 = por %p1567_p7, %p1566_p5 }
  0x15   : > { %p1561_p1 = pnand %p1559_p0, %p1549_p13 }
  0x17   : > { %p1562_p2 = pneg %p1561_p1 }
  0x19   : > { %p1569_p3 = pnand %p1568_p9, %p1562_p2 }
  0x1b   : > { %1572 = shalt.err (!%p1569_p3)
}
  0x1c   : > { %s2240_s5 = smov 64   ;;  %s2241_s6 = smov 4  }
  0x1d   : > { %s2247_s0 = sld [smem:[#allocation15_spill]]  ;;  %p31_p3 = scmp.ge.s32.totalorder %s29_s29, 3 }
  0x1e   : > { %s201_s9 = sand.u32 1, %s1741_s20   ;;  %s203_s10 = sand.u32 1, %s1729_s17  }
  0x1f   : > { %s2260_s29 = smov (%p31_p3, %s29_s29), 0  ;;  %s1285_s11 = sshll.u32 %s203_s10, 8 }
  0x20   : > { %s80_s12 = ssub.s32 %s1737_s19, %s2260_s29  ;;  %s1406_s13 = sshll.u32 %s1737_s19, 12 }
  0x21   : > { %p81_p4 = scmp.eq.s32.totalorder %s80_s12, 0  ;;  %s211_s25 = scalar_lea.hbm %s2236_s2, %s1406_s13 }
  0x22   : > { %s205_s30 = scalar_lea.vmem [#allocation8], %s1285_s11  ;;  %s1877_s8 = scalar_lea.sflag [#allocation4], %s201_s9 }
  0x23   : > { %1460 = dma.hbm_to_vmem [thread:$0]  (!%p1838_p11), %s2247_s0, 128, %s172_s26, [#allocation4], %s2240_s5, %s2240_s5, %s2241_s6  }
  0x24   : > { %s212_s7 = sshll.u32 %s205_s30, 4  ;;  %p1575_p10 = pneg %p1842_p12  ;;  %s213_s7 = int_to_ptr.vmem [resolvable:$true] %s212_s7 }
  0x25   : > { %s1875_s26 = scalar_select %p81_p4, %s1729_s17, %s83_s22  }
  0x26   : > { %s1586_s5 = scalar_lea.vmem %s213_s7, 4096  ;;  %s1746_s12 = smov [#allocation8]  }
  0x27   : > { %p1587_p0 = scmp.ne.s32.totalorder %s213_s7, %s1586_s5  ;;  %s1591_s6 = sshll.u32 %s1746_s12, 4  ;;  %s1592_s6 = int_to_ptr.vmem [resolvable:$false] %s1591_s6 }
  0x28   : > { %s1593_s13 = scalar_lea.vmem %s1592_s6, 8192  ;;  %p1594_p5 = scmp.lt.s32.totalorder %s213_s7, %s1592_s6 }
  0x29   : > { %p1589_p1 = pnand %p1587_p0, %p1575_p10  ;;  %p1595_p7 = scmp.lt.s32.totalorder %s1593_s13, %s1586_s5 }
  0x2b   : > { %p1590_p2 = pneg %p1589_p1  ;;  %p1596_p9 = por %p1595_p7, %p1594_p5 }
  0x2d   : > { %p1597_p3 = pnand %p1596_p9, %p1590_p2 }
  0x2f   : > { %1600 = shalt.err (!%p1597_p3)
}
  0x30   : > { %s1747_s22 = smov 128   ;;  %s1748_s9 = smov 8  }
  0x31   : > { %1467 = dma.hbm_to_vmem [thread:$0]  (!%p1842_p12), %s211_s25, 4096, %s213_s7, %s1877_s8, %s1747_s22, %s1747_s22, %s1748_s9  }
  0x32   : > { %s1749_s11 = smov [#allocation6]   ;;  %s1288_s15 = sshll.u32 %s203_s10, 1 }
  0x33   : > { %s187_s14 = sshll.u32 %s1749_s11, 4  ;;  %s188_s14 = int_to_ptr.vmem [resolvable:$true] %s187_s14 }
  0x34   : > { %s1612_s30 = scalar_lea.vmem %s188_s14, 128  ;;  %p1620_p2 = scmp.lt.s32.totalorder %s188_s14, %s188_s14 }
  0x35   : > { %p1613_p4 = scmp.ne.s32.totalorder %s188_s14, %s1612_s30  ;;  %p1621_p5 = scmp.lt.s32.totalorder %s1612_s30, %s1612_s30 }
  0x37   : > { %p1615_p0 = pnand %p1613_p4, %p1549_p13  ;;  %p1622_p7 = por %p1621_p5, %p1620_p2 }
  0x39   : > { %p1616_p1 = pneg %p1615_p0 }
  0x3b   : > { %p1623_p9 = pnand %p1622_p7, %p1616_p1 }
  0x3d   : > { %1626 = shalt.err (!%p1623_p9)
}
  0x3e   : > { %s2248_s5 = smov 4   ;;  %s2249_s6 = smov 64  }
  0x3f   : > { %1463 = dma.hbm_to_vmem [thread:$0]  (!%p1838_p11), %s2235_s1, 128, %s188_s14, [#allocation7], %s2249_s6, %s2249_s6, %s2248_s5  }
  0x40   : > { %s1407_s10 = sshll.u32 %s1737_s19, 5  ;;  %s226_s12 = scalar_lea.vmem [#allocation9], %s1288_s15 }
  0x41   : > { %s234_s13 = sshll.u32 %s226_s12, 4  ;;  %s232_s11 = scalar_lea.hbm %s2237_s3, %s1407_s10  ;;  %s235_s13 = int_to_ptr.vmem [resolvable:$true] %s234_s13 }
  0x42   : > { %s1640_s30 = scalar_lea.vmem %s235_s13, 32  ;;  %s1750_s27 = smov [#allocation9]  }
  0x43   : > { %p1641_p13 = scmp.ne.s32.totalorder %s235_s13, %s1640_s30  ;;  %s1645_s0 = sshll.u32 %s1750_s27, 4  ;;  %s1646_s0 = int_to_ptr.vmem [resolvable:$false] %s1645_s0 }
  0x44   : > { %s1647_s25 = scalar_lea.vmem %s1646_s0, 64  ;;  %p1648_p0 = scmp.lt.s32.totalorder %s235_s13, %s1646_s0 }
  0x45   : > { %p1643_p3 = pnand %p1641_p13, %p1575_p10  ;;  %p1649_p11 = scmp.lt.s32.totalorder %s1647_s25, %s1640_s30 }
  0x47   : > { %p1644_p4 = pneg %p1643_p3  ;;  %p1650_p1 = por %p1649_p11, %p1648_p0 }
  0x49   : > { %p1651_p2 = pnand %p1650_p1, %p1644_p4 }
  0x4b   : > { %1654 = shalt.err (!%p1651_p2)
}
  0x4c   : > { %1470 = dma.hbm_to_vmem [thread:$0]  (!%p1842_p12), %s232_s11, 32, %s235_s13, %s1877_s8  }
  0x4d   : > { %243 = sbr.rel (%p1829_p8) target bundleno = 1366 (0x556), region = 36  ;;  %p2250_p5 = scmp.eq.s32.totalorder (!%p1829_p8), %s1813_s21, 0 }
  0x52   : > { %1704 = dma.done.wait (%p2250_p5), [#allocation4], 128   ;;  %p2251_p10 = pmov %p2250_p5 }
  0x53   : > { %p2252_p7 = pmov %p2250_p5 }
  0x54   : > { %1706 = vsyncadd (%p2251_p10), [#allocation4], 4294967168 }
  0x55   : > { %1708 = dma.done.wait (%p2252_p7), [#allocation7], 128   ;;  %p2253_p9 = pmov %p2250_p5 }
  0x56   : > { %s253_s0 = sand.u32 1, %s1813_s21   ;;  %s255_s28 = sand.u32 1, %s1725_s16  }
  0x57   : > { %1710 = vsyncadd (%p2253_p9), [#allocation7], 4294967168  ;;  %s1294_s8 = sshll.u32 %s255_s28, 8  ;;  %s254_s24 = scalar_lea.sflag [#allocation4], %s253_s0 }
  0x58   : > { %s1922_s14 = scalar_lea.vmem [#allocation8], %s1294_s8 }
  0x59   : > { %1712 = dma.done.wait (%p1824_p6), %s254_s24, 4128  }
  0x5a   : > { %1714 = vsyncadd (%p1824_p6), %s254_s24, 4294963168  ;;  %v1928_v0 = vld [vmem:[#allocation6] sm:$0xf]  ;;  %v1930_v1 = vld [vmem:[#allocation6 + $0x4] sm:$0xf]  ;;  %s1295_s23 = sshll.u32 %s255_s28, 1 }
  0x5b   : > { %v1933_v2 = vld [vmem:[%s1922_s14] sm:$0xff]  ;;  %v1936_v3 = vld [vmem:[%s1922_s14 + $0x8] sm:$0xff]  ;;  %v1939_v4 = vld [vmem:[%s1922_s14 + $0x10] sm:$0xff]  ;;  %s266_s15 = scalar_lea.vmem [#allocation9], %s1295_s23  ;;  %p1296_p6 = scmp.ne.s32.totalorder %s1733_s18, 0 }
  0x5c   : > { %v1942_v5 = vld [vmem:[%s1922_s14 + $0x18] sm:$0xff]  ;;  %v1945_v6 = vld [vmem:[%s1922_s14 + $0x20] sm:$0xff]  ;;  %v1948_v7 = vld [vmem:[%s1922_s14 + $0x28] sm:$0xff] }
  0x5d   : > { %v1951_v8 = vld [vmem:[%s1922_s14 + $0x30] sm:$0xff]  ;;  %v1954_v9 = vld [vmem:[%s1922_s14 + $0x38] sm:$0xff]  ;;  %v1957_v10 = vld [vmem:[%s1922_s14 + $0x40] sm:$0xff] }
  0x5e   : > { %v1960_v11 = vld [vmem:[%s1922_s14 + $0x48] sm:$0xff]  ;;  %v1963_v12 = vld [vmem:[%s1922_s14 + $0x50] sm:$0xff]  ;;  %v1966_v13 = vld [vmem:[%s1922_s14 + $0x58] sm:$0xff] }
  0x5f   : > { %v1969_v14 = vld [vmem:[%s1922_s14 + $0x60] sm:$0xff]  ;;  %v1972_v15 = vld [vmem:[%s1922_s14 + $0x68] sm:$0xff]  ;;  %v1975_v16 = vld [vmem:[%s1922_s14 + $0x70] sm:$0xff] }
  0x60   : > { %v1978_v17 = vld [vmem:[%s1922_s14 + $0x78] sm:$0xff]  ;;  %v1981_v18 = vld [vmem:[%s1922_s14 + $0x80] sm:$0xff]  ;;  %v1984_v19 = vld [vmem:[%s1922_s14 + $0x88] sm:$0xff] }
  0x61   : > { %v1987_v20 = vld [vmem:[%s1922_s14 + $0x90] sm:$0xff]  ;;  %v1990_v21 = vld [vmem:[%s1922_s14 + $0x98] sm:$0xff]  ;;  %v1993_v22 = vld [vmem:[%s1922_s14 + $0xa0] sm:$0xff]  ;;  %333 = sbr.rel (%p1296_p6) target bundleno = 512 (0x200), region = 56 }
  0x62   : > { %v1996_v23 = vld [vmem:[%s1922_s14 + $0xa8] sm:$0xff]  ;;  %v1999_v24 = vld [vmem:[%s1922_s14 + $0xb0] sm:$0xff]  ;;  %v2002_v25 = vld [vmem:[%s1922_s14 + $0xb8] sm:$0xff] }
  0x63   : > { %v2005_v26 = vld [vmem:[%s1922_s14 + $0xc0] sm:$0xff]  ;;  %v2008_v27 = vld [vmem:[%s1922_s14 + $0xc8] sm:$0xff]  ;;  %v2011_v28 = vld [vmem:[%s1922_s14 + $0xd0] sm:$0xff] }
  0x64   : > { %v2014_v29 = vld [vmem:[%s1922_s14 + $0xd8] sm:$0xff]  ;;  %v2017_v30 = vld [vmem:[%s1922_s14 + $0xe0] sm:$0xff]  ;;  %v2020_v31 = vld [vmem:[%s1922_s14 + $0xe8] sm:$0xff] }
  0x65   : > { %v2023_v32 = vld [vmem:[%s1922_s14 + $0xf0] sm:$0xff]  ;;  %v2026_v33 = vld [vmem:[%s1922_s14 + $0xf8] sm:$0xff]  ;;  %v2028_v34 = vld [vmem:[%s266_s15] sm:$0x3] }
  0x66   : > { %v1540_v35 = vld [vmem:[#allocation3] sm:$0xff]   ;;  %v1315_v36 = vcombine.high %v1975_v16, %v1978_v17  ;;  %v1314_v37 = vcombine.low %v1975_v16, %v1978_v17  ;;  %v1751_v38 = vmov 0.0   ;;  %v1297_v39 = vcombine.low %v1928_v0, %v1930_v1 }
  0x67   : > { %1435 = vmatprep.subr.bf16.mxu0 %v1751_v38  ;;  %v1313_v40 = vcombine.high %v1969_v14, %v1972_v15  ;;  %vm1752_vm0 = vmmov 0   ;;  %vm347_vm1 = vcmask 130048   ;;  %v1312_v41 = vcombine.low %v1969_v14, %v1972_v15 }
  0x68   : > { %1436 = vmatpush3.bf16.msra.mxu0 %v1540_v35  ;;  %1437 = vmatprep.mubr.msk.bf16.mxu0 %vm1752_vm0, %v1751_v38  ;;  %v1311_v42 = vcombine.high %v1963_v12, %v1966_v13  ;;  %v1310_v43 = vcombine.low %v1963_v12, %v1966_v13  ;;  %v1309_v44 = vcombine.high %v1957_v10, %v1960_v11  ;;  %v1753_v54 = vmov 0  }
  0x69   : > { %484 = vmatprep.subr.bf16.mxu1 %v1315_v36  ;;  %v1308_v45 = vcombine.low %v1957_v10, %v1960_v11  ;;  %v1307_v46 = vcombine.high %v1951_v8, %v1954_v9  ;;  %v1306_v47 = vcombine.low %v1951_v8, %v1954_v9  ;;  %v1305_v48 = vcombine.high %v1945_v6, %v1948_v7 }
  0x6a   : > { %485 = vmatpush1.bf16.msra.mxu1 %v1314_v37  ;;  %v1304_v49 = vcombine.low %v1945_v6, %v1948_v7  ;;  %v1303_v50 = vcombine.high %v1939_v4, %v1942_v5  ;;  %v1302_v51 = vcombine.low %v1939_v4, %v1942_v5  ;;  %v1301_v52 = vcombine.high %v1933_v2, %v1936_v3 }
  0x6b   : > { %1438 = vmatmul.mubr.msk.bf16.vlgmr.msra.gmra.mxu0 %vm347_vm1, %v1297_v39  ;;  %486 = vmatprep.subr.bf16.mxu1 %v1313_v40  ;;  %v1300_v53 = vcombine.low %v1933_v2, %v1936_v3  ;;  %v394_v60 = vlaneseq }
  0x6c   : > { %516 = vmatprep.mubr.bf16.mxu1 %v1753_v54 }
  0x6d   : > { %v395_v61 = vshrl.u32 %v394_v60, 7 }
  0x6e   : > { %487 = vmatpush1.bf16.msra.mxu1 %v1312_v41 }
  0x6f   : > { %488 = vmatprep.subr.bf16.mxu1 %v1311_v42  ;;  %v396_v62 = vsub.s32 0, %v395_v61  ;;  %v400_v63 = vsub.s32 1, %v395_v61 }
  0x71   : > { %v397_v35 = vrot.slane %v2028_v34, %v396_v62  ;;  %v401_v36 = vrot.slane %v2028_v34, %v400_v63 }
  0x72   : > { %489 = vmatpush1.bf16.msra.mxu1 %v1310_v43 }
  0x73   : > { %490 = vmatprep.subr.bf16.mxu1 %v1309_v44 }
  0x76   : > { %491 = vmatpush1.bf16.msra.mxu1 %v1308_v45 }
  0x77   : > { %492 = vmatprep.subr.bf16.mxu1 %v1307_v46 }
  0x7a   : > { %493 = vmatpush1.bf16.msra.mxu1 %v1306_v47 }
  0x7b   : > { %494 = vmatprep.subr.bf16.mxu1 %v1305_v48 }
  0x7e   : > { %495 = vmatpush1.bf16.msra.mxu1 %v1304_v49 }
  0x7f   : > { %496 = vmatprep.subr.bf16.mxu1 %v1303_v50 }
  0x82   : > { %497 = vmatpush1.bf16.msra.mxu1 %v1302_v51 }
  0x83   : > { %498 = vmatprep.subr.bf16.mxu1 %v1301_v52 }
  0x86   : > { %499 = vmatpush1.bf16.msra.mxu1 %v1300_v53 }
 0x12b   : > { %v385_v55 = vpop.f32.mrf.mxu0 }
 0x12d   : > { %v1439_v56 = vpop.f32.mrf.mxu0 }
 0x12f   : > { %v388_v57 = vpop.f32.mrf.mxu0 }
 0x130   : > { %v392_v58 = vpack.c.bf16 %v388_v57, %v385_v55 }
 0x131   : > { %v1440_v59 = vpop.f32.mrf.mxu0 }
 0x132   : > { %517 = vmatmul.mubr.bf16.vlgmr.msra.gmra.mxu1 %v392_v58 }
 0x1f2   : > { %v518_v37 = vpop.f32.mrf.mxu1 }
 0x1f3   : > { %v519_v38 = vadd.f32 %v518_v37, %v397_v35 }
 0x1f4   : > { %v520_v39 = vpop.f32.mrf.mxu1 }
 0x1f5   : > { %v521_v40 = vadd.f32 %v520_v39, %v401_v36  ;;  %v527_v42 = vmax.f32 %v519_v38, 0.0 }
 0x1f6   : > { %v522_v41 = vpop.f32.mrf.mxu1 }
 0x1f7   : > { %v528_v43 = vmax.f32 %v521_v40, 0.0  ;;  %v523_v44 = vadd.f32 %v522_v41, %v397_v35 }
 0x1f8   : > { %v524_v45 = vpop.f32.mrf.mxu1 }
 0x1f9   : > { %v1408_v46 = vpack.c.bf16 %v528_v43, %v527_v42  ;;  %v529_v47 = vmax.f32 %v523_v44, 0.0  ;;  %v525_v48 = vadd.f32 %v524_v45, %v401_v36 }
 0x1fb   : > { %548 = vst [vmem:[#allocation2 + $0x10] sm:$0xff] %v1408_v46  ;;  %v1421_v49 = vpack.c.bf16 %v529_v47, %v527_v42  ;;  %v530_v50 = vmax.f32 %v525_v48, 0.0 }
 0x1fd   : > { %1422 = vst [vmem:[#allocation10] sm:$0xff] %v1421_v49   ;;  %v1409_v51 = vpack.c.bf16 %v530_v50, %v529_v47 }
 0x1ff   : > { %549 = vst [vmem:[#allocation2] sm:$0xff] %v1409_v51 }
 0x200 PF: > { %p1320_p8 = scmp.ne.s32.totalorder %s1733_s18, 1 }
 0x202   : > { %559 = sbr.rel (%p1320_p8) target bundleno = 932 (0x3a4), region = 60 }
 0x207   : > { %v1541_v52 = vld [vmem:[#allocation2 + $0x14] ss:$-16 sps:$4 sm:$0xff]   ;;  %v1340_v53 = vcombine.high %v1975_v16, %v1978_v17  ;;  %v1543_v54 = vld [vmem:[#allocation2 + $0x10] ss:$-16 sps:$4 sm:$0xff]   ;;  %v1754_v55 = vmov 0   ;;  %v1339_v56 = vcombine.low %v1975_v16, %v1978_v17  ;;  %v1338_v57 = vcombine.high %v1969_v14, %v1972_v15 }
 0x208   : > { %613 = vmatprep.mubr.bf16.mxu0 %v1754_v55  ;;  %595 = vmatprep.subr.bf16.mxu0 %v1541_v52  ;;  %v1321_v58 = vcombine.low %v1928_v0, %v1930_v1  ;;  %vm577_vm2 = vcmask 130048   ;;  %v1337_v59 = vcombine.low %v1969_v14, %v1972_v15  ;;  %v1336_v60 = vcombine.high %v1963_v12, %v1966_v13 }
 0x209   : > { %797 = vmatprep.subr.bf16.mxu1 %v1340_v53  ;;  %596 = vmatpush1.bf16.msra.mxu0 %v1543_v54  ;;  %v1335_v61 = vcombine.low %v1963_v12, %v1966_v13  ;;  %v1334_v62 = vcombine.high %v1957_v10, %v1960_v11  ;;  %v1333_v63 = vcombine.low %v1957_v10, %v1960_v11 }
 0x20a   : > { %798 = vmatpush1.bf16.msra.mxu1 %v1339_v56  ;;  %v1332_v35 = vcombine.high %v1951_v8, %v1954_v9  ;;  %v1331_v36 = vcombine.low %v1951_v8, %v1954_v9  ;;  %v1330_v37 = vcombine.high %v1945_v6, %v1948_v7  ;;  %v1329_v38 = vcombine.low %v1945_v6, %v1948_v7 }
 0x20b   : > { %799 = vmatprep.subr.bf16.mxu1 %v1338_v57  ;;  %v1328_v39 = vcombine.high %v1939_v4, %v1942_v5  ;;  %v1327_v40 = vcombine.low %v1939_v4, %v1942_v5  ;;  %v1326_v41 = vcombine.high %v1933_v2, %v1936_v3  ;;  %v1325_v42 = vcombine.low %v1933_v2, %v1936_v3 }
 0x20c   : > { %1324 = vmatmul.mubr.msk.bf16.vlgmr.msra.gmra.mxu0 %vm577_vm2, %v1321_v58  ;;  %v1356_v43 = vcombine.high %v2023_v32, %v2026_v33  ;;  %v1355_v44 = vcombine.low %v2023_v32, %v2026_v33  ;;  %v1354_v45 = vcombine.high %v2017_v30, %v2020_v31  ;;  %v1353_v46 = vcombine.low %v2017_v30, %v2020_v31 }
 0x20d   : > { %v1352_v47 = vcombine.high %v2011_v28, %v2014_v29  ;;  %v1351_v48 = vcombine.low %v2011_v28, %v2014_v29  ;;  %v1350_v49 = vcombine.high %v2005_v26, %v2008_v27  ;;  %v1349_v50 = vcombine.low %v2005_v26, %v2008_v27 }
 0x20e   : > { %800 = vmatpush1.bf16.msra.mxu1 %v1337_v59  ;;  %v1348_v51 = vcombine.high %v1999_v24, %v2002_v25  ;;  %v1347_v52 = vcombine.low %v1999_v24, %v2002_v25  ;;  %v1346_v53 = vcombine.high %v1993_v22, %v1996_v23  ;;  %v1345_v54 = vcombine.low %v1993_v22, %v1996_v23 }
 0x20f   : > { %801 = vmatprep.subr.bf16.mxu1 %v1336_v60  ;;  %v1344_v55 = vcombine.high %v1987_v20, %v1990_v21  ;;  %v1343_v56 = vcombine.low %v1987_v20, %v1990_v21  ;;  %v1342_v57 = vcombine.high %v1981_v18, %v1984_v19  ;;  %v1341_v58 = vcombine.low %v1981_v18, %v1984_v19 }
 0x212   : > { %802 = vmatpush1.bf16.msra.mxu1 %v1335_v61 }
 0x213   : > { %803 = vmatprep.subr.bf16.mxu1 %v1334_v62 }
 0x216   : > { %804 = vmatpush1.bf16.msra.mxu1 %v1333_v63 }
 0x217   : > { %805 = vmatprep.subr.bf16.mxu1 %v1332_v35 }
 0x21a   : > { %806 = vmatpush1.bf16.msra.mxu1 %v1331_v36  ;;  %v627_v36 = vlaneseq }
 0x21b   : > { %807 = vmatprep.subr.bf16.mxu1 %v1330_v37 }
 0x21c   : > { %v628_v37 = vshrl.u32 %v627_v36, 7 }
 0x21e   : > { %808 = vmatpush1.bf16.msra.mxu1 %v1329_v38  ;;  %v629_v38 = vsub.s32 0, %v628_v37 }
 0x21f   : > { %809 = vmatprep.subr.bf16.mxu1 %v1328_v39  ;;  %v633_v39 = vsub.s32 1, %v628_v37 }
 0x222   : > { %810 = vmatpush1.bf16.msra.mxu1 %v1327_v40  ;;  %v630_v40 = vrot.slane %v2028_v34, %v629_v38 }
 0x223   : > { %811 = vmatprep.subr.bf16.mxu1 %v1326_v41  ;;  %v634_v41 = vrot.slane %v2028_v34, %v633_v39 }
 0x226   : > { %812 = vmatpush1.bf16.msra.mxu1 %v1325_v42 }
 0x227   : > { %813 = vmatprep.subr.bf16.mxu1 %v1356_v43 }
 0x22a   : > { %814 = vmatpush2.bf16.msra.mxu1 %v1355_v44 }
 0x22b   : > { %815 = vmatprep.subr.bf16.mxu1 %v1354_v45 }
 0x22e   : > { %816 = vmatpush2.bf16.msra.mxu1 %v1353_v46 }
 0x22f   : > { %817 = vmatprep.subr.bf16.mxu1 %v1352_v47 }
 0x232   : > { %818 = vmatpush2.bf16.msra.mxu1 %v1351_v48 }
 0x233   : > { %819 = vmatprep.subr.bf16.mxu1 %v1350_v49 }
 0x236   : > { %820 = vmatpush2.bf16.msra.mxu1 %v1349_v50 }
 0x237   : > { %821 = vmatprep.subr.bf16.mxu1 %v1348_v51 }
 0x23a   : > { %822 = vmatpush2.bf16.msra.mxu1 %v1347_v52 }
 0x23b   : > { %823 = vmatprep.subr.bf16.mxu1 %v1346_v53 }
 0x23e   : > { %824 = vmatpush2.bf16.msra.mxu1 %v1345_v54 }
 0x23f   : > { %825 = vmatprep.subr.bf16.mxu1 %v1344_v55 }
 0x242   : > { %826 = vmatpush2.bf16.msra.mxu1 %v1343_v56 }
 0x243   : > { %827 = vmatprep.subr.bf16.mxu1 %v1342_v57 }
 0x246   : > { %828 = vmatpush2.bf16.msra.mxu1 %v1341_v58 }
 0x2cc   : > { %v615_v59 = vpop.f32.mrf.mxu0 }
 0x2ce   : > { %v617_v60 = vpop.f32.mrf.mxu0 }
 0x2d0   : > { %v619_v61 = vpop.f32.mrf.mxu0 }
 0x2d1   : > { %v624_v35 = vpack.c.bf16 %v619_v61, %v615_v59 }
 0x2d2   : > { %v621_v62 = vpop.f32.mrf.mxu0 }
 0x2d3   : > { %v625_v63 = vpack.c.bf16 %v621_v62, %v617_v60 }
 0x2d5   : > { %829 = vmatprep.mubr.bf16.mxu1 %v625_v63 }
 0x2d6   : > { %830 = vmatmul.mubr.bf16.vlgmr.msra.gmra.mxu1 %v624_v35 }
 0x396   : > { %v831_v42 = vpop.f32.mrf.mxu1 }
 0x397   : > { %v832_v43 = vadd.f32 %v831_v42, %v630_v40 }
 0x398   : > { %v833_v44 = vpop.f32.mrf.mxu1 }
 0x399   : > { %v834_v45 = vadd.f32 %v833_v44, %v634_v41  ;;  %v840_v47 = vmax.f32 %v832_v43, 0.0 }
 0x39a   : > { %v835_v46 = vpop.f32.mrf.mxu1 }
 0x39b   : > { %v841_v48 = vmax.f32 %v834_v45, 0.0  ;;  %v836_v49 = vadd.f32 %v835_v46, %v630_v40 }
 0x39c   : > { %v837_v50 = vpop.f32.mrf.mxu1 }
 0x39d   : > { %v1412_v51 = vpack.c.bf16 %v841_v48, %v840_v47  ;;  %v842_v52 = vmax.f32 %v836_v49, 0.0  ;;  %v838_v53 = vadd.f32 %v837_v50, %v634_v41 }
 0x39f   : > { %1359 = vst [vmem:[#allocation2 + $0x18] sm:$0xff] %v1412_v51  ;;  %v1426_v54 = vpack.c.bf16 %v842_v52, %v840_v47  ;;  %v843_v55 = vmax.f32 %v838_v53, 0.0 }
 0x3a1   : > { %1427 = vst [vmem:[#allocation10] sm:$0xff] %v1426_v54   ;;  %v1413_v56 = vpack.c.bf16 %v843_v55, %v842_v52 }
 0x3a3   : > { %1360 = vst [vmem:[#allocation2 + $0x8] sm:$0xff] %v1413_v56 }
 0x3a4 PF: > { %p1363_p12 = scmp.ne.s32.totalorder %s1733_s18, 2 }
 0x3a6   : > { %873 = sbr.rel (%p1363_p12) target bundleno = 1350 (0x546), region = 64 }
 0x3ab   : > { %v1544_v57 = vld [vmem:[#allocation2 + $0x1c] ss:$-16 sps:$4 sm:$0xff]   ;;  %v1383_v58 = vcombine.high %v1975_v16, %v1978_v17  ;;  %v1546_v59 = vld [vmem:[#allocation2 + $0x18] ss:$-16 sps:$4 sm:$0xff]   ;;  %v1755_v60 = vmov 0   ;;  %v1382_v61 = vcombine.low %v1975_v16, %v1978_v17  ;;  %v1381_v62 = vcombine.high %v1969_v14, %v1972_v15 }
 0x3ac   : > { %928 = vmatprep.mubr.bf16.mxu0 %v1755_v60  ;;  %910 = vmatprep.subr.bf16.mxu0 %v1544_v57  ;;  %v1364_v63 = vcombine.low %v1928_v0, %v1930_v1  ;;  %vm892_vm3 = vcmask 130048   ;;  %v1380_v35 = vcombine.low %v1969_v14, %v1972_v15  ;;  %v1379_v36 = vcombine.high %v1963_v12, %v1966_v13 }
 0x3ad   : > { %1107 = vmatprep.subr.bf16.mxu1 %v1383_v58  ;;  %911 = vmatpush1.bf16.msra.mxu0 %v1546_v59  ;;  %v1378_v16 = vcombine.low %v1963_v12, %v1966_v13  ;;  %v1377_v0 = vcombine.high %v1957_v10, %v1960_v11  ;;  %v1376_v1 = vcombine.low %v1957_v10, %v1960_v11  ;;  %v942_v40 = vlaneseq }
 0x3ae   : > { %1108 = vmatpush1.bf16.msra.mxu1 %v1382_v61  ;;  %v1375_v14 = vcombine.high %v1951_v8, %v1954_v9  ;;  %v1374_v15 = vcombine.low %v1951_v8, %v1954_v9  ;;  %v1373_v12 = vcombine.high %v1945_v6, %v1948_v7  ;;  %v1372_v13 = vcombine.low %v1945_v6, %v1948_v7 }
 0x3af   : > { %1109 = vmatprep.subr.bf16.mxu1 %v1381_v62  ;;  %v1371_v10 = vcombine.high %v1939_v4, %v1942_v5  ;;  %v1370_v11 = vcombine.low %v1939_v4, %v1942_v5  ;;  %v1369_v8 = vcombine.high %v1933_v2, %v1936_v3  ;;  %v1368_v9 = vcombine.low %v1933_v2, %v1936_v3 }
 0x3b0   : > { %1367 = vmatmul.mubr.msk.bf16.vlgmr.msra.gmra.mxu0 %vm892_vm3, %v1364_v63  ;;  %v1399_v6 = vcombine.high %v2023_v32, %v2026_v33  ;;  %v1398_v7 = vcombine.low %v2023_v32, %v2026_v33  ;;  %v1397_v4 = vcombine.high %v2017_v30, %v2020_v31  ;;  %v1396_v5 = vcombine.low %v2017_v30, %v2020_v31 }
 0x3b1   : > { %v1395_v2 = vcombine.high %v2011_v28, %v2014_v29  ;;  %v1394_v3 = vcombine.low %v2011_v28, %v2014_v29  ;;  %v1393_v17 = vcombine.high %v2005_v26, %v2008_v27  ;;  %v1392_v32 = vcombine.low %v2005_v26, %v2008_v27 }
 0x3b2   : > { %1110 = vmatpush1.bf16.msra.mxu1 %v1380_v35  ;;  %v1391_v30 = vcombine.high %v1999_v24, %v2002_v25  ;;  %v1390_v31 = vcombine.low %v1999_v24, %v2002_v25  ;;  %v1389_v28 = vcombine.high %v1993_v22, %v1996_v23  ;;  %v1388_v29 = vcombine.low %v1993_v22, %v1996_v23 }
 0x3b3   : > { %1111 = vmatprep.subr.bf16.mxu1 %v1379_v36  ;;  %v1387_v26 = vcombine.high %v1987_v20, %v1990_v21  ;;  %v1386_v27 = vcombine.low %v1987_v20, %v1990_v21  ;;  %v1385_v24 = vcombine.high %v1981_v18, %v1984_v19  ;;  %v1384_v25 = vcombine.low %v1981_v18, %v1984_v19 }
 0x3b4   : > { %v943_v20 = vshrl.u32 %v942_v40, 7 }
 0x3b6   : > { %1112 = vmatpush1.bf16.msra.mxu1 %v1378_v16  ;;  %v944_v21 = vsub.s32 0, %v943_v20 }
 0x3b7   : > { %1113 = vmatprep.subr.bf16.mxu1 %v1377_v0 }
 0x3b8   : > { %v945_v41 = vrot.slane %v2028_v34, %v944_v21 }
 0x3ba   : > { %1114 = vmatpush1.bf16.msra.mxu1 %v1376_v1 }
 0x3bb   : > { %1115 = vmatprep.subr.bf16.mxu1 %v1375_v14 }
 0x3be   : > { %1116 = vmatpush1.bf16.msra.mxu1 %v1374_v15 }
 0x3bf   : > { %1117 = vmatprep.subr.bf16.mxu1 %v1373_v12 }
 0x3c2   : > { %1118 = vmatpush1.bf16.msra.mxu1 %v1372_v13 }
 0x3c3   : > { %1119 = vmatprep.subr.bf16.mxu1 %v1371_v10 }
 0x3c6   : > { %1120 = vmatpush1.bf16.msra.mxu1 %v1370_v11 }
 0x3c7   : > { %1121 = vmatprep.subr.bf16.mxu1 %v1369_v8 }
 0x3ca   : > { %1122 = vmatpush1.bf16.msra.mxu1 %v1368_v9 }
 0x3cb   : > { %1123 = vmatprep.subr.bf16.mxu1 %v1399_v6 }
 0x3ce   : > { %1124 = vmatpush2.bf16.msra.mxu1 %v1398_v7 }
 0x3cf   : > { %1125 = vmatprep.subr.bf16.mxu1 %v1397_v4 }
 0x3d2   : > { %1126 = vmatpush2.bf16.msra.mxu1 %v1396_v5 }
 0x3d3   : > { %1127 = vmatprep.subr.bf16.mxu1 %v1395_v2 }
 0x3d6   : > { %1128 = vmatpush2.bf16.msra.mxu1 %v1394_v3 }
 0x3d7   : > { %1129 = vmatprep.subr.bf16.mxu1 %v1393_v17 }
 0x3da   : > { %1130 = vmatpush2.bf16.msra.mxu1 %v1392_v32 }
 0x3db   : > { %1131 = vmatprep.subr.bf16.mxu1 %v1391_v30 }
 0x3de   : > { %1132 = vmatpush2.bf16.msra.mxu1 %v1390_v31 }
 0x3df   : > { %1133 = vmatprep.subr.bf16.mxu1 %v1389_v28 }
 0x3e2   : > { %1134 = vmatpush2.bf16.msra.mxu1 %v1388_v29 }
 0x3e3   : > { %1135 = vmatprep.subr.bf16.mxu1 %v1387_v26 }
 0x3e6   : > { %1136 = vmatpush2.bf16.msra.mxu1 %v1386_v27 }
 0x3e7   : > { %1137 = vmatprep.subr.bf16.mxu1 %v1385_v24 }
 0x3ea   : > { %1138 = vmatpush2.bf16.msra.mxu1 %v1384_v25 }
 0x470   : > { %v930_v33 = vpop.f32.mrf.mxu0 }
 0x472   : > { %v932_v22 = vpop.f32.mrf.mxu0 }
 0x474   : > { %v934_v23 = vpop.f32.mrf.mxu0 }
 0x475   : > { %v939_v39 = vpack.c.bf16 %v934_v23, %v930_v33 }
 0x476   : > { %v936_v37 = vpop.f32.mrf.mxu0 }
 0x477   : > { %v940_v38 = vpack.c.bf16 %v936_v37, %v932_v22 }
 0x479   : > { %1139 = vmatprep.mubr.bf16.mxu1 %v940_v38 }
 0x47a   : > { %1140 = vmatmul.mubr.bf16.vlgmr.msra.gmra.mxu1 %v939_v39 }
 0x53a   : > { %v1141_v42 = vpop.f32.mrf.mxu1 }
 0x53b   : > { %v1142_v44 = vadd.f32 %v1141_v42, %v945_v41 }
 0x53c   : > { %v1143_v43 = vpop.f32.mrf.mxu1 }
 0x53d   : > { %v1148_v46 = vmax.f32 %v1142_v44, 0.0 }
 0x53e   : > { %v1144_v45 = vpop.f32.mrf.mxu1 }
 0x53f   : > { %v1145_v18 = vadd.f32 %v1144_v45, %v945_v41 }
 0x540   : > { %v1146_v19 = vpop.f32.mrf.mxu1 }
 0x541   : > { %v1149_v47 = vmax.f32 %v1145_v18, 0.0 }
 0x543   : > { %v1431_v48 = vpack.c.bf16 %v1149_v47, %v1148_v46 }
 0x545   : > { %1432 = vst [vmem:[#allocation10] sm:$0xff] %v1431_v48  }
 0x546 PF: > { %p1476_p13 = scmp.eq.s32.totalorder %s1813_s21, 2  ;;  %s1756_s18 = smov [#allocation10]  }
 0x547   : > { %s1169_s5 = sshll.u32 %s1756_s18, 4  ;;  %s1170_s5 = int_to_ptr.vmem [resolvable:$true] %s1169_s5 }
 0x548   : > { %s1655_s6 = scalar_lea.vmem %s1170_s5, 128  ;;  %p1662_p11 = scmp.lt.s32.totalorder %s1170_s5, %s1170_s5 }
 0x549   : > { %p1656_p3 = scmp.ne.s32.totalorder %s1170_s5, %s1655_s6  ;;  %p1663_p1 = scmp.lt.s32.totalorder %s1655_s6, %s1655_s6 }
 0x54b   : > { %p1657_p4 = pnand %p1656_p3, %p1476_p13  ;;  %p1664_p2 = por %p1663_p1, %p1662_p11 }
 0x54d   : > { %p1658_p0 = pneg %p1657_p4 }
 0x54f   : > { %p1665_p5 = pnand %p1664_p2, %p1658_p0 }
 0x551   : > { %1668 = shalt.err (!%p1665_p5)
}
 0x552   : > { %s1757_s7 = smov 64   ;;  %s1758_s10 = smov 4  }
 0x553   : > { %1454 = dma.vmem_to_hbm [thread:$0]  (%p1476_p13), %s1170_s5, 128, %s2238_s4, [#allocation5], %s1757_s7, %s1757_s7, %s1758_s10  }
 0x554   : > { %1716 = dma.done.wait (%p1476_p13), [#allocation5], 128  }
 0x555   : > { %1718 = vsyncadd (%p1476_p13), [#allocation5], 4294967168 }
 0x556 PF: > { %s17_s20 = sadd.s32 1, %s1741_s20   ;;  %s2254_s15 = smov %s1725_s16 }
 0x557   : > { %p14_p10 = scmp.ge.s32.totalorder %s17_s20, 5   ;;  %s2255_s16 = smov %s1729_s17 }
 0x558   : > { %s2256_s17 = smov %s1875_s26  ;;  %s2257_s18 = smov %s1737_s19 }
 0x559   : > { %s2258_s19 = smov %s2260_s29  ;;  %16 = sbr.rel (!%p14_p10) target bundleno = 7 (0x7), region = 108 }
 0x55e   :  { %1185 = vsyncpa [#allocation4], 1 }
 0x55f   :  { %1187 = vsyncpa [#allocation4 + $0x1], 1 }
 0x560   :  { %1188 = vsyncpa [#allocation7], 1 }
 0x561   :  { %1189 = vsyncpa [#allocation5], 1 }
 0x562   :  { %1191 = vsyncpa [#allocation5 + $0x1], 1 }

</bundles_post_ra>
